<compile_context>
chip_gen: v7x
topology: tpu7x:2x2x1
jax: 0.10.0
libtpu: 0.0.40
codegen_flags: <defaults>
</compile_context>

<pallas_src>
import functools
import math

import jax
import jax.numpy as jnp
from jax.experimental import pallas as pl
from jax.experimental.pallas import tpu as pltpu


def _embed_gather_kernel(ids_ref, emb_hbm, o_ref, sems, *, scale, tile, nsem):
    # ids_ref : (n_padded,) int32 in SMEM (scalar-prefetched token ids)
    # emb_hbm : (V, D_pad) embedding table, raw HBM ref (memory_space=pl.ANY)
    # o_ref   : (tile, D_pad) output block in VMEM (resident for this step)
    # sems    : (nsem,) DMA semaphores -> nsem row gathers in flight
    i = pl.program_id(0)
    base = i * tile
    mask = nsem - 1  # nsem is a power of two

    def start(t):
        row = ids_ref[base + t]
        pltpu.make_async_copy(emb_hbm.at[row], o_ref.at[t],
                              sems.at[t & mask]).start()

    def wait(t):
        # Wait only needs a same-shaped descriptor on the same semaphore.
        pltpu.make_async_copy(emb_hbm.at[0], o_ref.at[t],
                              sems.at[t & mask]).wait()

    # Prime the first `nsem` row gathers (static unroll, nsem is small).
    for t in range(min(nsem, tile)):
        start(t)

    # Steady state: retire slot for row t, immediately reissue it for t + nsem.
    @pl.loop(0, tile)
    def _(t):
        wait(t)

        @pl.when(t + nsem < tile)
        def _():
            start(t + nsem)

    # All rows landed: apply sqrt(d_model) in f32, cast, dense writeback.
    o_ref[...] = (o_ref[...].astype(jnp.float32) * scale).astype(o_ref.dtype)


def _round_up(x, m):
    return (x + m - 1) // m * m


def input_embeddings(ids, emb_table, *, tile=256, nsem=8):
    """out[b, s, :] = emb_table[ids[b, s], :] * sqrt(d_model)."""
    B, S = ids.shape
    V, D = emb_table.shape
    scale = float(math.sqrt(D))  # scale uses the *original* d_model

    # Lane-dense output: pad d_model to a multiple of 128 (sliced off below).
    D_pad = _round_up(D, 128)
    if D_pad != D:
        emb_table = jnp.pad(emb_table, ((0, 0), (0, D_pad - D)))

    # Flatten tokens; clamp ids (no OOB DMA); pad to a tile multiple.
    N = B * S
    tile = max(8, min(tile, _round_up(N, 8)))      # f32 sublane-aligned
    nsem = max(1, min(nsem, tile))
    while nsem & (nsem - 1):                        # keep nsem a power of two
        nsem -= 1

    n_tiles = int(pl.cdiv(N, tile))
    n_padded = n_tiles * tile
    ids_flat = jnp.clip(ids.reshape(N).astype(jnp.int32), 0, V - 1)
    if n_padded != N:
        ids_flat = jnp.pad(ids_flat, (0, n_padded - N))

    out = pl.pallas_call(
        functools.partial(_embed_gather_kernel,
                          scale=scale, tile=tile, nsem=nsem),
        out_shape=jax.ShapeDtypeStruct((n_padded, D_pad), emb_table.dtype),
        grid_spec=pltpu.PrefetchScalarGridSpec(
            num_scalar_prefetch=1,
            grid=(n_tiles,),
            in_specs=[
                # Embedding table stays in HBM; gathered manually via DMA.
                pl.BlockSpec(memory_space=pl.ANY),
            ],
            out_specs=pl.BlockSpec((tile, D_pad), lambda i, ids: (i, 0)),
            scratch_shapes=[pltpu.SemaphoreType.DMA((nsem,))],
        ),
        compiler_params=pltpu.CompilerParams(
            dimension_semantics=("parallel",)),
    )(ids_flat, emb_table)

    return out[:N, :D].reshape(B, S, D)


if __name__ == "__main__":
    key = jax.random.PRNGKey(0)

    # Small test matching the module (d_model=32, vocab=97, batch=2, seq=8).
    B, S, D, V = 2, 8, 32, 97
    k_ids, k_emb, k_ids2, k_emb2 = jax.random.split(key, 4)
    ids = jax.random.randint(k_ids, (B, S), 0, V, dtype=jnp.int32)
    emb = jax.random.normal(k_emb, (V, D), dtype=jnp.float32)

    out = input_embeddings(ids, emb)
    jax.block_until_ready(out)
    ref = jnp.take(emb, ids, axis=0) * math.sqrt(D)
    assert out.shape == (B, S, D) and out.dtype == jnp.float32
    assert jnp.allclose(out, ref, atol=1e-5, rtol=1e-5)

    # Second config: multi-tile path, D already a multiple of 128,
    # N not a multiple of the tile (exercises padding + steady-state DMAs).
    B2, S2, D2, V2 = 2, 320, 128, 1000
    ids2 = jax.random.randint(k_ids2, (B2, S2), 0, V2, dtype=jnp.int32)
    emb2 = jax.random.normal(k_emb2, (V2, D2), dtype=jnp.float32)

    out2 = input_embeddings(ids2, emb2)
    jax.block_until_ready(out2)
    ref2 = jnp.take(emb2, ids2, axis=0) * math.sqrt(D2)
    assert out2.shape == (B2, S2, D2)
    assert jnp.allclose(out2, ref2, atol=1e-5, rtol=1e-5)

    print("KERNEL_OK")
</pallas_src>

<mosaic_0001>
module attributes {stable_mosaic.version = 11 : i64} {
  func.func @_embed_gather_kernel(%arg0: i32, %arg1: memref<16xi32, #tpu.memory_space<smem>>, %arg2: memref<97x128xf32, #tpu.memory_space<any>>, %arg3: memref<16x128xf32, #tpu.memory_space<vmem>>, %arg4: memref<8x!tpu.dma_semaphore, #tpu.memory_space<semaphore_mem>>) attributes {dimension_semantics = [#tpu.dimension_semantics<parallel>], iteration_bounds = array<i64: 1>, scalar_prefetch = 1 : i64, scratch_operands = 1 : i64, tpu.core_type = #tpu.core_type<tc>, window_params = [{}, {transform_indices = @transform_1, window_bounds = array<i64: 16, 128>}]} {
    %c16_i32 = arith.constant 16 : i32
    %0 = arith.muli %arg0, %c16_i32 : i32
    %c0_i32 = arith.constant 0 : i32
    %1 = arith.addi %0, %c0_i32 : i32
    %2 = arith.index_cast %1 : i32 to index
    %3 = memref.load %arg1[%2] : memref<16xi32, #tpu.memory_space<smem>>
    %c0_i32_0 = arith.constant 0 : i32
    %c0_i32_1 = arith.constant 0 : i32
    %c0_i32_2 = arith.constant 0 : i32
    %4 = tpu.memref_slice %arg2[%3, %c0_i32_2] : memref<97x128xf32, #tpu.memory_space<any>> -> memref<1x128xf32, #tpu.memory_space<any>>
    %5 = tpu.memref_squeeze %4 : memref<1x128xf32, #tpu.memory_space<any>> -> memref<128xf32, #tpu.memory_space<any>>
    %c0_i32_3 = arith.constant 0 : i32
    %6 = tpu.memref_slice %arg3[%c0_i32_0, %c0_i32_3] : memref<16x128xf32, #tpu.memory_space<vmem>> -> memref<1x128xf32, #tpu.memory_space<vmem>>
    %7 = tpu.memref_squeeze %6 : memref<1x128xf32, #tpu.memory_space<vmem>> -> memref<128xf32, #tpu.memory_space<vmem>>
    %8 = tpu.memref_slice %arg4[%c0_i32_1] : memref<8x!tpu.dma_semaphore, #tpu.memory_space<semaphore_mem>> -> memref<1x!tpu.dma_semaphore, #tpu.memory_space<semaphore_mem>>
    %9 = tpu.memref_squeeze %8 : memref<1x!tpu.dma_semaphore, #tpu.memory_space<semaphore_mem>> -> memref<!tpu.dma_semaphore, #tpu.memory_space<semaphore_mem>>
    tpu.enqueue_dma source(%5 : memref<128xf32, #tpu.memory_space<any>>) target(%7 : memref<128xf32, #tpu.memory_space<vmem>>) target_semaphore(%9 : memref<!tpu.dma_semaphore, #tpu.memory_space<semaphore_mem>>)
    %c1_i32 = arith.constant 1 : i32
    %10 = arith.addi %0, %c1_i32 : i32
    %11 = arith.index_cast %10 : i32 to index
    %12 = memref.load %arg1[%11] : memref<16xi32, #tpu.memory_space<smem>>
    %c1_i32_4 = arith.constant 1 : i32
    %c1_i32_5 = arith.constant 1 : i32
    %c0_i32_6 = arith.constant 0 : i32
    %13 = tpu.memref_slice %arg2[%12, %c0_i32_6] : memref<97x128xf32, #tpu.memory_space<any>> -> memref<1x128xf32, #tpu.memory_space<any>>
    %14 = tpu.memref_squeeze %13 : memref<1x128xf32, #tpu.memory_space<any>> -> memref<128xf32, #tpu.memory_space<any>>
    %c0_i32_7 = arith.constant 0 : i32
    %15 = tpu.memref_slice %arg3[%c1_i32_4, %c0_i32_7] : memref<16x128xf32, #tpu.memory_space<vmem>> -> memref<1x128xf32, #tpu.memory_space<vmem>>
    %16 = tpu.memref_squeeze %15 : memref<1x128xf32, #tpu.memory_space<vmem>> -> memref<128xf32, #tpu.memory_space<vmem>>
    %17 = tpu.memref_slice %arg4[%c1_i32_5] : memref<8x!tpu.dma_semaphore, #tpu.memory_space<semaphore_mem>> -> memref<1x!tpu.dma_semaphore, #tpu.memory_space<semaphore_mem>>
    %18 = tpu.memref_squeeze %17 : memref<1x!tpu.dma_semaphore, #tpu.memory_space<semaphore_mem>> -> memref<!tpu.dma_semaphore, #tpu.memory_space<semaphore_mem>>
    tpu.enqueue_dma source(%14 : memref<128xf32, #tpu.memory_space<any>>) target(%16 : memref<128xf32, #tpu.memory_space<vmem>>) target_semaphore(%18 : memref<!tpu.dma_semaphore, #tpu.memory_space<semaphore_mem>>)
    %c2_i32 = arith.constant 2 : i32
    %19 = arith.addi %0, %c2_i32 : i32
    %20 = arith.index_cast %19 : i32 to index
    %21 = memref.load %arg1[%20] : memref<16xi32, #tpu.memory_space<smem>>
    %c2_i32_8 = arith.constant 2 : i32
    %c2_i32_9 = arith.constant 2 : i32
    %c0_i32_10 = arith.constant 0 : i32
    %22 = tpu.memref_slice %arg2[%21, %c0_i32_10] : memref<97x128xf32, #tpu.memory_space<any>> -> memref<1x128xf32, #tpu.memory_space<any>>
    %23 = tpu.memref_squeeze %22 : memref<1x128xf32, #tpu.memory_space<any>> -> memref<128xf32, #tpu.memory_space<any>>
    %c0_i32_11 = arith.constant 0 : i32
    %24 = tpu.memref_slice %arg3[%c2_i32_8, %c0_i32_11] : memref<16x128xf32, #tpu.memory_space<vmem>> -> memref<1x128xf32, #tpu.memory_space<vmem>>
    %25 = tpu.memref_squeeze %24 : memref<1x128xf32, #tpu.memory_space<vmem>> -> memref<128xf32, #tpu.memory_space<vmem>>
    %26 = tpu.memref_slice %arg4[%c2_i32_9] : memref<8x!tpu.dma_semaphore, #tpu.memory_space<semaphore_mem>> -> memref<1x!tpu.dma_semaphore, #tpu.memory_space<semaphore_mem>>
    %27 = tpu.memref_squeeze %26 : memref<1x!tpu.dma_semaphore, #tpu.memory_space<semaphore_mem>> -> memref<!tpu.dma_semaphore, #tpu.memory_space<semaphore_mem>>
    tpu.enqueue_dma source(%23 : memref<128xf32, #tpu.memory_space<any>>) target(%25 : memref<128xf32, #tpu.memory_space<vmem>>) target_semaphore(%27 : memref<!tpu.dma_semaphore, #tpu.memory_space<semaphore_mem>>)
    %c3_i32 = arith.constant 3 : i32
    %28 = arith.addi %0, %c3_i32 : i32
    %29 = arith.index_cast %28 : i32 to index
    %30 = memref.load %arg1[%29] : memref<16xi32, #tpu.memory_space<smem>>
    %c3_i32_12 = arith.constant 3 : i32
    %c3_i32_13 = arith.constant 3 : i32
    %c0_i32_14 = arith.constant 0 : i32
    %31 = tpu.memref_slice %arg2[%30, %c0_i32_14] : memref<97x128xf32, #tpu.memory_space<any>> -> memref<1x128xf32, #tpu.memory_space<any>>
    %32 = tpu.memref_squeeze %31 : memref<1x128xf32, #tpu.memory_space<any>> -> memref<128xf32, #tpu.memory_space<any>>
    %c0_i32_15 = arith.constant 0 : i32
    %33 = tpu.memref_slice %arg3[%c3_i32_12, %c0_i32_15] : memref<16x128xf32, #tpu.memory_space<vmem>> -> memref<1x128xf32, #tpu.memory_space<vmem>>
    %34 = tpu.memref_squeeze %33 : memref<1x128xf32, #tpu.memory_space<vmem>> -> memref<128xf32, #tpu.memory_space<vmem>>
    %35 = tpu.memref_slice %arg4[%c3_i32_13] : memref<8x!tpu.dma_semaphore, #tpu.memory_space<semaphore_mem>> -> memref<1x!tpu.dma_semaphore, #tpu.memory_space<semaphore_mem>>
    %36 = tpu.memref_squeeze %35 : memref<1x!tpu.dma_semaphore, #tpu.memory_space<semaphore_mem>> -> memref<!tpu.dma_semaphore, #tpu.memory_space<semaphore_mem>>
    tpu.enqueue_dma source(%32 : memref<128xf32, #tpu.memory_space<any>>) target(%34 : memref<128xf32, #tpu.memory_space<vmem>>) target_semaphore(%36 : memref<!tpu.dma_semaphore, #tpu.memory_space<semaphore_mem>>)
    %c4_i32 = arith.constant 4 : i32
    %37 = arith.addi %0, %c4_i32 : i32
    %38 = arith.index_cast %37 : i32 to index
    %39 = memref.load %arg1[%38] : memref<16xi32, #tpu.memory_space<smem>>
    %c4_i32_16 = arith.constant 4 : i32
    %c4_i32_17 = arith.constant 4 : i32
    %c0_i32_18 = arith.constant 0 : i32
    %40 = tpu.memref_slice %arg2[%39, %c0_i32_18] : memref<97x128xf32, #tpu.memory_space<any>> -> memref<1x128xf32, #tpu.memory_space<any>>
    %41 = tpu.memref_squeeze %40 : memref<1x128xf32, #tpu.memory_space<any>> -> memref<128xf32, #tpu.memory_space<any>>
    %c0_i32_19 = arith.constant 0 : i32
    %42 = tpu.memref_slice %arg3[%c4_i32_16, %c0_i32_19] : memref<16x128xf32, #tpu.memory_space<vmem>> -> memref<1x128xf32, #tpu.memory_space<vmem>>
    %43 = tpu.memref_squeeze %42 : memref<1x128xf32, #tpu.memory_space<vmem>> -> memref<128xf32, #tpu.memory_space<vmem>>
    %44 = tpu.memref_slice %arg4[%c4_i32_17] : memref<8x!tpu.dma_semaphore, #tpu.memory_space<semaphore_mem>> -> memref<1x!tpu.dma_semaphore, #tpu.memory_space<semaphore_mem>>
    %45 = tpu.memref_squeeze %44 : memref<1x!tpu.dma_semaphore, #tpu.memory_space<semaphore_mem>> -> memref<!tpu.dma_semaphore, #tpu.memory_space<semaphore_mem>>
    tpu.enqueue_dma source(%41 : memref<128xf32, #tpu.memory_space<any>>) target(%43 : memref<128xf32, #tpu.memory_space<vmem>>) target_semaphore(%45 : memref<!tpu.dma_semaphore, #tpu.memory_space<semaphore_mem>>)
    %c5_i32 = arith.constant 5 : i32
    %46 = arith.addi %0, %c5_i32 : i32
    %47 = arith.index_cast %46 : i32 to index
    %48 = memref.load %arg1[%47] : memref<16xi32, #tpu.memory_space<smem>>
    %c5_i32_20 = arith.constant 5 : i32
    %c5_i32_21 = arith.constant 5 : i32
    %c0_i32_22 = arith.constant 0 : i32
    %49 = tpu.memref_slice %arg2[%48, %c0_i32_22] : memref<97x128xf32, #tpu.memory_space<any>> -> memref<1x128xf32, #tpu.memory_space<any>>
    %50 = tpu.memref_squeeze %49 : memref<1x128xf32, #tpu.memory_space<any>> -> memref<128xf32, #tpu.memory_space<any>>
    %c0_i32_23 = arith.constant 0 : i32
    %51 = tpu.memref_slice %arg3[%c5_i32_20, %c0_i32_23] : memref<16x128xf32, #tpu.memory_space<vmem>> -> memref<1x128xf32, #tpu.memory_space<vmem>>
    %52 = tpu.memref_squeeze %51 : memref<1x128xf32, #tpu.memory_space<vmem>> -> memref<128xf32, #tpu.memory_space<vmem>>
    %53 = tpu.memref_slice %arg4[%c5_i32_21] : memref<8x!tpu.dma_semaphore, #tpu.memory_space<semaphore_mem>> -> memref<1x!tpu.dma_semaphore, #tpu.memory_space<semaphore_mem>>
    %54 = tpu.memref_squeeze %53 : memref<1x!tpu.dma_semaphore, #tpu.memory_space<semaphore_mem>> -> memref<!tpu.dma_semaphore, #tpu.memory_space<semaphore_mem>>
    tpu.enqueue_dma source(%50 : memref<128xf32, #tpu.memory_space<any>>) target(%52 : memref<128xf32, #tpu.memory_space<vmem>>) target_semaphore(%54 : memref<!tpu.dma_semaphore, #tpu.memory_space<semaphore_mem>>)
    %c6_i32 = arith.constant 6 : i32
    %55 = arith.addi %0, %c6_i32 : i32
    %56 = arith.index_cast %55 : i32 to index
    %57 = memref.load %arg1[%56] : memref<16xi32, #tpu.memory_space<smem>>
    %c6_i32_24 = arith.constant 6 : i32
    %c6_i32_25 = arith.constant 6 : i32
    %c0_i32_26 = arith.constant 0 : i32
    %58 = tpu.memref_slice %arg2[%57, %c0_i32_26] : memref<97x128xf32, #tpu.memory_space<any>> -> memref<1x128xf32, #tpu.memory_space<any>>
    %59 = tpu.memref_squeeze %58 : memref<1x128xf32, #tpu.memory_space<any>> -> memref<128xf32, #tpu.memory_space<any>>
    %c0_i32_27 = arith.constant 0 : i32
    %60 = tpu.memref_slice %arg3[%c6_i32_24, %c0_i32_27] : memref<16x128xf32, #tpu.memory_space<vmem>> -> memref<1x128xf32, #tpu.memory_space<vmem>>
    %61 = tpu.memref_squeeze %60 : memref<1x128xf32, #tpu.memory_space<vmem>> -> memref<128xf32, #tpu.memory_space<vmem>>
    %62 = tpu.memref_slice %arg4[%c6_i32_25] : memref<8x!tpu.dma_semaphore, #tpu.memory_space<semaphore_mem>> -> memref<1x!tpu.dma_semaphore, #tpu.memory_space<semaphore_mem>>
    %63 = tpu.memref_squeeze %62 : memref<1x!tpu.dma_semaphore, #tpu.memory_space<semaphore_mem>> -> memref<!tpu.dma_semaphore, #tpu.memory_space<semaphore_mem>>
    tpu.enqueue_dma source(%59 : memref<128xf32, #tpu.memory_space<any>>) target(%61 : memref<128xf32, #tpu.memory_space<vmem>>) target_semaphore(%63 : memref<!tpu.dma_semaphore, #tpu.memory_space<semaphore_mem>>)
    %c7_i32 = arith.constant 7 : i32
    %64 = arith.addi %0, %c7_i32 : i32
    %65 = arith.index_cast %64 : i32 to index
    %66 = memref.load %arg1[%65] : memref<16xi32, #tpu.memory_space<smem>>
    %c7_i32_28 = arith.constant 7 : i32
    %c7_i32_29 = arith.constant 7 : i32
    %c0_i32_30 = arith.constant 0 : i32
    %67 = tpu.memref_slice %arg2[%66, %c0_i32_30] : memref<97x128xf32, #tpu.memory_space<any>> -> memref<1x128xf32, #tpu.memory_space<any>>
    %68 = tpu.memref_squeeze %67 : memref<1x128xf32, #tpu.memory_space<any>> -> memref<128xf32, #tpu.memory_space<any>>
    %c0_i32_31 = arith.constant 0 : i32
    %69 = tpu.memref_slice %arg3[%c7_i32_28, %c0_i32_31] : memref<16x128xf32, #tpu.memory_space<vmem>> -> memref<1x128xf32, #tpu.memory_space<vmem>>
    %70 = tpu.memref_squeeze %69 : memref<1x128xf32, #tpu.memory_space<vmem>> -> memref<128xf32, #tpu.memory_space<vmem>>
    %71 = tpu.memref_slice %arg4[%c7_i32_29] : memref<8x!tpu.dma_semaphore, #tpu.memory_space<semaphore_mem>> -> memref<1x!tpu.dma_semaphore, #tpu.memory_space<semaphore_mem>>
    %72 = tpu.memref_squeeze %71 : memref<1x!tpu.dma_semaphore, #tpu.memory_space<semaphore_mem>> -> memref<!tpu.dma_semaphore, #tpu.memory_space<semaphore_mem>>
    tpu.enqueue_dma source(%68 : memref<128xf32, #tpu.memory_space<any>>) target(%70 : memref<128xf32, #tpu.memory_space<vmem>>) target_semaphore(%72 : memref<!tpu.dma_semaphore, #tpu.memory_space<semaphore_mem>>)
    %c0_i32_32 = arith.constant 0 : i32
    %c16_i32_33 = arith.constant 16 : i32
    %73 = arith.addi %c0_i32_32, %c16_i32_33 : i32
    %c1_i32_34 = arith.constant 1 : i32
    scf.for %arg5 = %c0_i32_32 to %73 step %c1_i32_34  : i32 {
      %c1_i32_39 = arith.constant 1 : i32
      %78 = arith.muli %arg5, %c1_i32_39 : i32
      %c0_i32_40 = arith.constant 0 : i32
      %79 = arith.addi %c0_i32_40, %78 : i32
      %c7_i32_41 = arith.constant 7 : i32
      %80 = arith.andi %79, %c7_i32_41 : i32
      %c0_i32_42 = arith.constant 0 : i32
      %c0_i32_43 = arith.constant 0 : i32
      %81 = tpu.memref_slice %arg2[%c0_i32_42, %c0_i32_43] : memref<97x128xf32, #tpu.memory_space<any>> -> memref<1x128xf32, #tpu.memory_space<any>>
      %82 = tpu.memref_squeeze %81 : memref<1x128xf32, #tpu.memory_space<any>> -> memref<128xf32, #tpu.memory_space<any>>
      %c0_i32_44 = arith.constant 0 : i32
      %83 = tpu.memref_slice %arg3[%79, %c0_i32_44] : memref<16x128xf32, #tpu.memory_space<vmem>> -> memref<1x128xf32, #tpu.memory_space<vmem>>
      %84 = tpu.memref_squeeze %83 : memref<1x128xf32, #tpu.memory_space<vmem>> -> memref<128xf32, #tpu.memory_space<vmem>>
      %85 = tpu.memref_slice %arg4[%80] : memref<8x!tpu.dma_semaphore, #tpu.memory_space<semaphore_mem>> -> memref<1x!tpu.dma_semaphore, #tpu.memory_space<semaphore_mem>>
      %86 = tpu.memref_squeeze %85 : memref<1x!tpu.dma_semaphore, #tpu.memory_space<semaphore_mem>> -> memref<!tpu.dma_semaphore, #tpu.memory_space<semaphore_mem>>
      tpu.wait_dma2 semaphore(%86 : memref<!tpu.dma_semaphore, #tpu.memory_space<semaphore_mem>>) src(%82 : memref<128xf32, #tpu.memory_space<any>>) dst(%84 : memref<128xf32, #tpu.memory_space<vmem>>)
      %c8_i32 = arith.constant 8 : i32
      %87 = arith.addi %79, %c8_i32 : i32
      %c16_i32_45 = arith.constant 16 : i32
      %88 = arith.cmpi slt, %87, %c16_i32_45 : i32
      %89 = arith.extui %88 : i1 to i32
      %c0_i32_46 = arith.constant 0 : i32
      %90 = arith.cmpi ne, %89, %c0_i32_46 : i32
      scf.if %90 {
        %c8_i32_47 = arith.constant 8 : i32
        %91 = arith.addi %79, %c8_i32_47 : i32
        %92 = arith.addi %0, %91 : i32
        %93 = arith.index_cast %92 : i32 to index
        %94 = memref.load %arg1[%93] : memref<16xi32, #tpu.memory_space<smem>>
        %c7_i32_48 = arith.constant 7 : i32
        %95 = arith.andi %91, %c7_i32_48 : i32
        %c0_i32_49 = arith.constant 0 : i32
        %96 = tpu.memref_slice %arg2[%94, %c0_i32_49] : memref<97x128xf32, #tpu.memory_space<any>> -> memref<1x128xf32, #tpu.memory_space<any>>
        %97 = tpu.memref_squeeze %96 : memref<1x128xf32, #tpu.memory_space<any>> -> memref<128xf32, #tpu.memory_space<any>>
        %c0_i32_50 = arith.constant 0 : i32
        %98 = tpu.memref_slice %arg3[%91, %c0_i32_50] : memref<16x128xf32, #tpu.memory_space<vmem>> -> memref<1x128xf32, #tpu.memory_space<vmem>>
        %99 = tpu.memref_squeeze %98 : memref<1x128xf32, #tpu.memory_space<vmem>> -> memref<128xf32, #tpu.memory_space<vmem>>
        %100 = tpu.memref_slice %arg4[%95] : memref<8x!tpu.dma_semaphore, #tpu.memory_space<semaphore_mem>> -> memref<1x!tpu.dma_semaphore, #tpu.memory_space<semaphore_mem>>
        %101 = tpu.memref_squeeze %100 : memref<1x!tpu.dma_semaphore, #tpu.memory_space<semaphore_mem>> -> memref<!tpu.dma_semaphore, #tpu.memory_space<semaphore_mem>>
        tpu.enqueue_dma source(%97 : memref<128xf32, #tpu.memory_space<any>>) target(%99 : memref<128xf32, #tpu.memory_space<vmem>>) target_semaphore(%101 : memref<!tpu.dma_semaphore, #tpu.memory_space<semaphore_mem>>)
      } else {
      }
    }
    %c16_i32_35 = arith.constant 16 : i32
    %c0 = arith.constant 0 : index
    %c0_36 = arith.constant 0 : index
    %74 = vector.load %arg3[%c0, %c0_36] : memref<16x128xf32, #tpu.memory_space<vmem>>, vector<16x128xf32>
    %cst = arith.constant 5.65685415 : f32
    %75 = vector.broadcast %cst : f32 to vector<16x128xf32>
    %76 = arith.mulf %74, %75 : vector<16x128xf32>
    %c0_37 = arith.constant 0 : index
    %c0_38 = arith.constant 0 : index
    %77 = vector.load %arg3[%c0_37, %c0_38] : memref<16x128xf32, #tpu.memory_space<vmem>>, vector<16x128xf32>
    tpu.vector_store %arg3[%c0_37, %c0_38], %76 {strides = array<i32>} : memref<16x128xf32, #tpu.memory_space<vmem>>, vector<16x128xf32>,
    return
  }
  func.func @transform_1(%arg0: i32, %arg1: memref<16xi32, #tpu.memory_space<smem>>) -> (i32, i32) {
    %c0_i32 = arith.constant 0 : i32
    %c0_i32_0 = arith.constant 0 : i32
    return %arg0, %c0_i32 : i32, i32
  }
}

</mosaic_0001>

<bundles_post_ra>
// kernel: tpu_custom_call.1
= control target key start
LH: loop header
LB: loop body
LE: loop exit
PB: predicated region body
PF: predicated region fallthrough
CT: control target
= control target key end

     0   :  { %s822_s0 = inlined_call_operand.hbm [shape: s32[16], index: 0, kind: input, shape index: {}]   ;;  %s823_s1 = inlined_call_operand.hbm [shape: f32[97,128], index: 1, kind: input, shape index: {}]   ;;  %s824_s2 = inlined_call_operand.hbm [shape: f32[16,128], index: 2, kind: output, shape index: {}]  }
   0x1   :  { %s332_s11 = scalar_lea.hbm %s822_s0, 16 }
   0x2   :  { %p333_p0 = scmp.ne.s32.totalorder %s822_s0, %s332_s11  ;;  %p336_p1 = scmp.lt.u32.totalorder %s332_s11, %s822_s0 }
   0x4   :  { %p338_p2 = pnand %p336_p1, %p333_p0 }
   0x6   :  { %341 = shalt.err (!%p338_p2)  }
   0x7   :  { %s598_s16 = smov [#allocation4]  }
   0x8   :  { %8 = dma.hbm_to_smem %s822_s0, 16, %s598_s16, [#allocation3] }
   0x9   :  { %588 = dma.done.wait [#allocation3], 16 }
   0xa   :  { %589 = vsyncadd [#allocation3], 4294967280 }
   0xb   :  { %10 = sfence }
   0xc   :  { %11 = vsyncpa [#allocation6], 0  ;;  %s13_s19 = sld [smem:[#allocation4]]  ;;  %s599_s20 = smov [#allocation5]  }
   0xd   :  { %s23_s21 = sshll.u32 %s599_s20, 4  ;;  %s636_s22 = sld [smem:[#allocation4 + $0x1]]  ;;  %s638_s21 = int_to_ptr.vmem [resolvable:$true] %s23_s21 }
   0xe   :  { %s600_s23 = smov [#allocation5 + $0x1]   ;;  %s640_s25 = sld [smem:[#allocation4 + $0x2]] }
   0xf   :  { %s40_s24 = sshll.u32 %s600_s23, 4  ;;  %s601_s26 = smov [#allocation5 + $0x2]   ;;  %s642_s24 = int_to_ptr.vmem [resolvable:$true] %s40_s24 }
  0x10   :  { %s57_s0 = sshll.u32 %s601_s26, 4  ;;  %s644_s27 = sld [smem:[#allocation4 + $0x3]]  ;;  %s646_s0 = int_to_ptr.vmem [resolvable:$true] %s57_s0 }
  0x11   :  { %s655_s8 = scalar_lea.hbm %s823_s1, 1664 }
  0x12   :  { %s283_s28 = sshll.u32 %s13_s19, 4 }
  0x13   :  { %s15_s3 = scalar_lea.hbm %s823_s1, %s283_s28  ;;  %s285_s4 = sshll.u32 %s636_s22, 4 }
  0x14   :  { %s342_s5 = scalar_lea.hbm %s15_s3, 16  ;;  %p345_p4 = scmp.lt.u32.totalorder %s15_s3, %s823_s1 }
  0x15   :  { %p343_p3 = scmp.ne.s32.totalorder %s15_s3, %s342_s5  ;;  %p346_p5 = scmp.lt.u32.totalorder %s655_s8, %s342_s5 }
  0x16   :  { %p348_p7 = scmp.lt.u32.totalorder %s342_s5, %s15_s3 }
  0x17   :  { %p347_p6 = por %p346_p5, %p345_p4 }
  0x19   :  { %p349_p8 = por %p348_p7, %p347_p6 }
  0x1b   :  { %p350_p9 = pnand %p349_p8, %p343_p3 }
  0x1d   :  { %353 = shalt.err (!%p350_p9)  }
  0x1e   :  { %s354_s11 = scalar_lea.vmem %s638_s21, 16  ;;  %s664_s12 = scalar_lea.vmem %s638_s21, 256 }
  0x1f   :  { %p355_p10 = scmp.ne.s32.totalorder %s638_s21, %s354_s11  ;;  %p825_p11 = scmp.lt.s32.totalorder %s638_s21, %s638_s21 }
  0x20   :  { %p360_p12 = scmp.lt.s32.totalorder %s664_s12, %s354_s11 }
  0x22   :  { %p361_p13 = por %p360_p12, %p825_p11 }
  0x24   :  { %p362_p0 = pnand %p361_p13, %p355_p10 }
  0x26   :  { %365 = shalt.err (!%p362_p0)  }
  0x27   :  { %26 = dma.hbm_to_vmem [thread:$0]  %s15_s3, 16, %s638_s21, [#allocation2] }
  0x28   :  { %s30_s15 = scalar_lea.hbm %s823_s1, %s285_s4  ;;  %s287_s16 = sshll.u32 %s640_s25, 4 }
  0x29   :  { %s366_s17 = scalar_lea.hbm %s30_s15, 16  ;;  %p369_p2 = scmp.lt.u32.totalorder %s30_s15, %s823_s1 }
  0x2a   :  { %p367_p1 = scmp.ne.s32.totalorder %s30_s15, %s366_s17  ;;  %p370_p3 = scmp.lt.u32.totalorder %s655_s8, %s366_s17 }
  0x2b   :  { %p372_p5 = scmp.lt.u32.totalorder %s366_s17, %s30_s15 }
  0x2c   :  { %p371_p4 = por %p370_p3, %p369_p2 }
  0x2e   :  { %p373_p6 = por %p372_p5, %p371_p4 }
  0x30   :  { %p374_p7 = pnand %p373_p6, %p367_p1 }
  0x32   :  { %377 = shalt.err (!%p374_p7)  }
  0x33   :  { %s378_s20 = scalar_lea.vmem %s642_s24, 16  ;;  %p383_p9 = scmp.lt.s32.totalorder %s642_s24, %s638_s21 }
  0x34   :  { %p379_p8 = scmp.ne.s32.totalorder %s642_s24, %s378_s20  ;;  %p384_p10 = scmp.lt.s32.totalorder %s664_s12, %s378_s20 }
  0x36   :  { %p385_p12 = por %p384_p10, %p383_p9 }
  0x38   :  { %p386_p13 = pnand %p385_p12, %p379_p8 }
  0x3a   :  { %389 = shalt.err (!%p386_p13)  }
  0x3b   :  { %43 = dma.hbm_to_vmem [thread:$0]  %s30_s15, 16, %s642_s24, [#allocation2 + $0x1] }
  0x3c   :  { %s47_s25 = scalar_lea.hbm %s823_s1, %s287_s16  ;;  %s289_s26 = sshll.u32 %s644_s27, 4 }
  0x3d   :  { %s390_s28 = scalar_lea.hbm %s47_s25, 16  ;;  %p393_p1 = scmp.lt.u32.totalorder %s47_s25, %s823_s1 }
  0x3e   :  { %p391_p0 = scmp.ne.s32.totalorder %s47_s25, %s390_s28  ;;  %p394_p2 = scmp.lt.u32.totalorder %s655_s8, %s390_s28 }
  0x3f   :  { %p396_p4 = scmp.lt.u32.totalorder %s390_s28, %s47_s25 }
  0x40   :  { %p395_p3 = por %p394_p2, %p393_p1 }
  0x42   :  { %p397_p5 = por %p396_p4, %p395_p3 }
  0x44   :  { %p398_p6 = pnand %p397_p5, %p391_p0 }
  0x46   :  { %401 = shalt.err (!%p398_p6)  }
  0x47   :  { %s402_s24 = scalar_lea.vmem %s646_s0, 16  ;;  %p407_p8 = scmp.lt.s32.totalorder %s646_s0, %s638_s21 }
  0x48   :  { %p403_p7 = scmp.ne.s32.totalorder %s646_s0, %s402_s24  ;;  %p408_p9 = scmp.lt.s32.totalorder %s664_s12, %s402_s24 }
  0x4a   :  { %p409_p10 = por %p408_p9, %p407_p8 }
  0x4c   :  { %p410_p12 = pnand %p409_p10, %p403_p7 }
  0x4e   :  { %413 = shalt.err (!%p410_p12)  }
  0x4f   :  { %60 = dma.hbm_to_vmem [thread:$0]  %s47_s25, 16, %s646_s0, [#allocation2 + $0x2] }
  0x50   :  { %s64_s4 = scalar_lea.hbm %s823_s1, %s289_s26  ;;  %s602_s5 = smov [#allocation5 + $0x3]  }
  0x51   :  { %s74_s6 = sshll.u32 %s602_s5, 4  ;;  %s704_s7 = sld [smem:[#allocation4 + $0x4]]  ;;  %s75_s6 = int_to_ptr.vmem [resolvable:$true] %s74_s6 }
  0x52   :  { %s414_s9 = scalar_lea.hbm %s64_s4, 16  ;;  %p417_p0 = scmp.lt.u32.totalorder %s64_s4, %s823_s1 }
  0x53   :  { %p415_p13 = scmp.ne.s32.totalorder %s64_s4, %s414_s9  ;;  %p418_p1 = scmp.lt.u32.totalorder %s655_s8, %s414_s9 }
  0x54   :  { %p420_p3 = scmp.lt.u32.totalorder %s414_s9, %s64_s4 }
  0x55   :  { %p419_p2 = por %p418_p1, %p417_p0 }
  0x57   :  { %p421_p4 = por %p420_p3, %p419_p2 }
  0x59   :  { %p422_p5 = pnand %p421_p4, %p415_p13 }
  0x5b   :  { %425 = shalt.err (!%p422_p5)  }
  0x5c   :  { %s426_s0 = scalar_lea.vmem %s75_s6, 16  ;;  %p431_p7 = scmp.lt.s32.totalorder %s75_s6, %s638_s21 }
  0x5d   :  { %p427_p6 = scmp.ne.s32.totalorder %s75_s6, %s426_s0  ;;  %p432_p8 = scmp.lt.s32.totalorder %s664_s12, %s426_s0 }
  0x5f   :  { %p433_p9 = por %p432_p8, %p431_p7 }
  0x61   :  { %p434_p10 = pnand %p433_p9, %p427_p6 }
  0x63   :  { %437 = shalt.err (!%p434_p10)  }
  0x64   :  { %77 = dma.hbm_to_vmem [thread:$0]  %s64_s4, 16, %s75_s6, [#allocation2 + $0x3] }
  0x65   :  { %s603_s13 = smov [#allocation5 + $0x4]   ;;  %s712_s15 = sld [smem:[#allocation4 + $0x5]] }
  0x66   :  { %s91_s14 = sshll.u32 %s603_s13, 4  ;;  %s604_s16 = smov [#allocation5 + $0x5]   ;;  %s92_s14 = int_to_ptr.vmem [resolvable:$true] %s91_s14 }
  0x67   :  { %s108_s17 = sshll.u32 %s604_s16, 4  ;;  %s714_s18 = sld [smem:[#allocation4 + $0x6]]  ;;  %s717_s17 = int_to_ptr.vmem [resolvable:$true] %s108_s17 }
  0x68   :  { %s291_s19 = sshll.u32 %s704_s7, 4 }
  0x69   :  { %s81_s23 = scalar_lea.hbm %s823_s1, %s291_s19 }
  0x6a   :  { %s438_s25 = scalar_lea.hbm %s81_s23, 16  ;;  %p441_p13 = scmp.lt.u32.totalorder %s81_s23, %s823_s1 }
  0x6b   :  { %p439_p12 = scmp.ne.s32.totalorder %s81_s23, %s438_s25  ;;  %p442_p0 = scmp.lt.u32.totalorder %s655_s8, %s438_s25 }
  0x6c   :  { %p444_p2 = scmp.lt.u32.totalorder %s438_s25, %s81_s23 }
  0x6d   :  { %p443_p1 = por %p442_p0, %p441_p13 }
  0x6f   :  { %p445_p3 = por %p444_p2, %p443_p1 }
  0x71   :  { %p446_p4 = pnand %p445_p3, %p439_p12 }
  0x73   :  { %449 = shalt.err (!%p446_p4)  }
  0x74   :  { %s450_s29 = scalar_lea.vmem %s92_s14, 16  ;;  %p455_p6 = scmp.lt.s32.totalorder %s92_s14, %s638_s21 }
  0x75   :  { %p451_p5 = scmp.ne.s32.totalorder %s92_s14, %s450_s29  ;;  %p456_p7 = scmp.lt.s32.totalorder %s664_s12, %s450_s29 }
  0x77   :  { %p457_p8 = por %p456_p7, %p455_p6 }
  0x79   :  { %p458_p9 = pnand %p457_p8, %p451_p5 }
  0x7b   :  { %461 = shalt.err (!%p458_p9)  }
  0x7c   :  { %94 = dma.hbm_to_vmem [thread:$0]  %s81_s23, 16, %s92_s14, [#allocation2 + $0x4] }
  0x7d   :  { %s293_s30 = sshll.u32 %s712_s15, 4  ;;  %s605_s24 = smov [#allocation5 + $0x6]  }
  0x7e   :  { %s125_s27 = sshll.u32 %s605_s24, 4  ;;  %s98_s5 = scalar_lea.hbm %s823_s1, %s293_s30  ;;  %s732_s27 = int_to_ptr.vmem [resolvable:$true] %s125_s27 }
  0x7f   :  { %s462_s6 = scalar_lea.hbm %s98_s5, 16  ;;  %p465_p12 = scmp.lt.u32.totalorder %s98_s5, %s823_s1 }
  0x80   :  { %p463_p10 = scmp.ne.s32.totalorder %s98_s5, %s462_s6  ;;  %p466_p13 = scmp.lt.u32.totalorder %s655_s8, %s462_s6 }
  0x81   :  { %p468_p1 = scmp.lt.u32.totalorder %s462_s6, %s98_s5 }
  0x82   :  { %p467_p0 = por %p466_p13, %p465_p12 }
  0x84   :  { %p469_p2 = por %p468_p1, %p467_p0 }
  0x86   :  { %p470_p3 = pnand %p469_p2, %p463_p10 }
  0x88   :  { %473 = shalt.err (!%p470_p3)  }
  0x89   :  { %s474_s10 = scalar_lea.vmem %s717_s17, 16  ;;  %p479_p5 = scmp.lt.s32.totalorder %s717_s17, %s638_s21 }
  0x8a   :  { %p475_p4 = scmp.ne.s32.totalorder %s717_s17, %s474_s10  ;;  %p480_p6 = scmp.lt.s32.totalorder %s664_s12, %s474_s10 }
  0x8c   :  { %p481_p7 = por %p480_p6, %p479_p5 }
  0x8e   :  { %p482_p8 = pnand %p481_p7, %p475_p4 }
  0x90   :  { %485 = shalt.err (!%p482_p8)  }
  0x91   :  { %111 = dma.hbm_to_vmem [thread:$0]  %s98_s5, 16, %s717_s17, [#allocation2 + $0x5] }
  0x92   :  { %s295_s11 = sshll.u32 %s714_s18, 4  ;;  %s296_s0 = sld [smem:[#allocation4 + $0x7]] }
  0x93   :  { %s115_s15 = scalar_lea.hbm %s823_s1, %s295_s11 }
  0x94   :  { %s486_s16 = scalar_lea.hbm %s115_s15, 16  ;;  %p489_p10 = scmp.lt.u32.totalorder %s115_s15, %s823_s1 }
  0x95   :  { %p487_p9 = scmp.ne.s32.totalorder %s115_s15, %s486_s16  ;;  %p490_p12 = scmp.lt.u32.totalorder %s655_s8, %s486_s16 }
  0x96   :  { %p492_p0 = scmp.lt.u32.totalorder %s486_s16, %s115_s15 }
  0x97   :  { %p491_p13 = por %p490_p12, %p489_p10 }
  0x99   :  { %p493_p1 = por %p492_p0, %p491_p13 }
  0x9b   :  { %p494_p2 = pnand %p493_p1, %p487_p9 }
  0x9d   :  { %497 = shalt.err (!%p494_p2)  }
  0x9e   :  { %s498_s17 = scalar_lea.vmem %s732_s27, 16  ;;  %p503_p4 = scmp.lt.s32.totalorder %s732_s27, %s638_s21 }
  0x9f   :  { %p499_p3 = scmp.ne.s32.totalorder %s732_s27, %s498_s17  ;;  %p504_p5 = scmp.lt.s32.totalorder %s664_s12, %s498_s17 }
  0xa1   :  { %p505_p6 = por %p504_p5, %p503_p4 }
  0xa3   :  { %p506_p7 = pnand %p505_p6, %p499_p3 }
  0xa5   :  { %509 = shalt.err (!%p506_p7)  }
  0xa6   :  { %128 = dma.hbm_to_vmem [thread:$0]  %s115_s15, 16, %s732_s27, [#allocation2 + $0x6] }
  0xa7   :  { %s606_s18 = smov [#allocation5 + $0x7]   ;;  %s297_s23 = sshll.u32 %s296_s0, 4 }
  0xa8   :  { %s142_s22 = sshll.u32 %s606_s18, 4  ;;  %s132_s28 = scalar_lea.hbm %s823_s1, %s297_s23  ;;  %s143_s22 = int_to_ptr.vmem [resolvable:$true] %s142_s22 }
  0xa9   :  { %s510_s29 = scalar_lea.hbm %s132_s28, 16  ;;  %p513_p9 = scmp.lt.u32.totalorder %s132_s28, %s823_s1 }
  0xaa   :  { %p511_p8 = scmp.ne.s32.totalorder %s132_s28, %s510_s29  ;;  %p514_p10 = scmp.lt.u32.totalorder %s655_s8, %s510_s29 }
  0xab   :  { %p516_p13 = scmp.lt.u32.totalorder %s510_s29, %s132_s28 }
  0xac   :  { %p515_p12 = por %p514_p10, %p513_p9 }
  0xae   :  { %p517_p0 = por %p516_p13, %p515_p12 }
  0xb0   :  { %p518_p1 = pnand %p517_p0, %p511_p8 }
  0xb2   :  { %521 = shalt.err (!%p518_p1)  }
  0xb3   :  { %s522_s27 = scalar_lea.vmem %s143_s22, 16  ;;  %p527_p3 = scmp.lt.s32.totalorder %s143_s22, %s638_s21 }
  0xb4   :  { %p523_p2 = scmp.ne.s32.totalorder %s143_s22, %s522_s27  ;;  %p528_p4 = scmp.lt.s32.totalorder %s664_s12, %s522_s27 }
  0xb6   :  { %p529_p5 = por %p528_p4, %p527_p3 }
  0xb8   :  { %p530_p6 = pnand %p529_p5, %p523_p2 }
  0xba   :  { %533 = shalt.err (!%p530_p6)  }
  0xbb   :  { %145 = dma.hbm_to_vmem [thread:$0]  %s132_s28, 16, %s143_s22, [#allocation2 + $0x7] }
  0xbc   :  { %s767_s3 = smov 0  }
  0xbd LB: > { %s152_s4 = sand.u32 7, %s596_s3  ;;  %s596_s3 = sphi %s767_s3, %s151_s3  }
  0xbe   : > { %s153_s5 = scalar_lea.sflag [#allocation2], %s152_s4 }
  0xbf   : > { %590 = dma.done.wait %s153_s5, 16 }
  0xc0   : > { %591 = vsyncadd %s153_s5, 4294967280  ;;  %s774_s6 = sadd.s32 8, %s596_s3  ;;  %s275_s10 = scalar_lea.vmem [#allocation5], %s596_s3 }
  0xc1   : > { %p312_p7 = scmp.lt.s32.totalorder %s774_s6, 16  ;;  %s276_s11 = scalar_lea.vmem %s275_s10, 8 [#allocation5] }
  0xc2   : > { %s163_s13 = sand.u32 7, %s774_s6  ;;  %s175_s14 = sshll.u32 %s276_s11, 4  ;;  %s176_s14 = int_to_ptr.vmem [resolvable:$true] %s175_s14 }
  0xc3   : > { %s309_s7 = scalar_select %p312_p7, [#allocation4], [#allocation27] }
  0xc4   : > { %s310_s9 = scalar_select %p312_p7, %s774_s6, 0 }
  0xc5   : > { %s167_s17 = scalar_lea.sflag [#allocation2], %s163_s13 }
  0xc6   : > { %s162_s0 = sld [smem:[%s309_s7 + %s310_s9]] }
  0xcc   : > { %s299_s15 = sshll.u32 %s162_s0, 4 }
  0xcd   : > { %s165_s20 = scalar_lea.hbm %s823_s1, %s299_s15 }
  0xce   : > { %s534_s18 = scalar_lea.hbm %s165_s20, 16  ;;  %p539_p12 = scmp.lt.u32.totalorder %s165_s20, %s823_s1 }
  0xcf   : > { %p535_p8 = scmp.ne.s32.totalorder %s165_s20, %s534_s18  ;;  %p540_p13 = scmp.lt.u32.totalorder %s655_s8, %s534_s18 }
  0xd0   : > { %p542_p1 = scmp.lt.u32.totalorder %s534_s18, %s165_s20 }
  0xd1   : > { %p536_p9 = pnand %p535_p8, %p312_p7  ;;  %p541_p0 = por %p540_p13, %p539_p12 }
  0xd3   : > { %p537_p10 = pneg %p536_p9  ;;  %p543_p2 = por %p542_p1, %p541_p0 }
  0xd5   : > { %p544_p3 = pnand %p543_p2, %p537_p10 }
  0xd7   : > { %547 = shalt.err (!%p544_p3)  }
  0xd8   : > { %s548_s25 = scalar_lea.vmem %s176_s14, 16  ;;  %p555_p8 = scmp.lt.s32.totalorder %s176_s14, %s638_s21 }
  0xd9   : > { %p549_p4 = scmp.ne.s32.totalorder %s176_s14, %s548_s25  ;;  %p556_p9 = scmp.lt.s32.totalorder %s664_s12, %s548_s25 }
  0xdb   : > { %p550_p5 = pnand %p549_p4, %p312_p7  ;;  %p557_p11 = por %p556_p9, %p555_p8 }
  0xdd   : > { %p551_p6 = pneg %p550_p5 }
  0xdf   : > { %p558_p12 = pnand %p557_p11, %p551_p6 }
  0xe1   : > { %561 = shalt.err (!%p558_p12)  }
  0xe2   : > { %311 = dma.hbm_to_vmem [thread:$0]  (%p312_p7), %s165_s20, 16, %s176_s14, %s167_s17 }
  0xe3   : > { %s151_s3 = sadd.s32 1, %s596_s3  }
  0xe4   : > { %p148_p10 = scmp.ge.s32.totalorder %s151_s3, 16  }
  0xe5   :  { %v179_v0 = vld [vmem:[#allocation5] sm:$0xff] (%p148_p10)  ;;  %v180_v1 = vld [vmem:[#allocation5 + $0x8] sm:$0xff] (%p148_p10)  ;;  %p563_p11 = scmp.ne.s32.totalorder (%p148_p10), %s638_s21, %s664_s12  ;;  %p568_p7 = scmp.lt.s32.totalorder (%p148_p10), %s664_s12, %s664_s12 }
  0xe6   :  { %150 = sbr.rel (!%p148_p10) target bundleno = 189 (0xbd), region = 100  ;;  %v181_v2 = vmul.f32 (%p148_p10), 5.656854, %v179_v0  ;;  %v182_v3 = vmul.f32 (%p148_p10), 5.656854, %v180_v1  ;;  %p826_p13 = scmp.lt.s32.totalorder (%p148_p10), %s638_s21, %s638_s21 }
  0xe8   :  { %183 = vst [vmem:[#allocation5] sm:$0xff] (%p148_p10), %v181_v2  ;;  %184 = vst [vmem:[#allocation5 + $0x8] sm:$0xff] (%p148_p10), %v182_v3  ;;  %p569_p0 = por (%p148_p10), %p568_p7, %p826_p13 }
  0xea   :  { %p570_p1 = pnand (%p148_p10), %p569_p0, %p563_p11 }
  0xed   :  { %573 = shalt.err (!%p570_p1)
}
  0xee   :  { %s574_s1 = scalar_lea.hbm %s824_s2, 256 }
  0xef   :  { %p575_p2 = scmp.ne.s32.totalorder %s824_s2, %s574_s1  ;;  %p578_p3 = scmp.lt.u32.totalorder %s574_s1, %s824_s2 }
  0xf1   :  { %p580_p4 = pnand %p578_p3, %p575_p2 }
  0xf3   :  { %583 = shalt.err (!%p580_p4)
}
  0xf4   :  { %s607_s27 = smov 128   ;;  %s608_s12 = smov 8  }
  0xf5   :  { %196 = dma.vmem_to_hbm [thread:$0]  %s638_s21, 256, %s824_s2, [#allocation6], %s607_s27, %s607_s27, %s608_s12  }
  0xf6   :  { %592 = dma.done.wait [#allocation6], 256  }
  0xf7   :  { %593 = vsyncadd [#allocation6], 4294967040 }
  0xf8   :  { %200 = vsyncpa [#allocation6], 1 }
  0xf9   :  { %201 = vsyncmov [#allocation2] }
  0xfc   :  { %s202_s5 = vpop.sfrf %201 }
  0xfd   :  { %p300_p5 = scmp.ne.s32.totalorder %s202_s5, 0 }
  0xff   :  { %206 = shalt.err (%p300_p5)  }
 0x100   :  { %208 = vsyncmov [#allocation2 + $0x1] }
 0x103   :  { %s209_s6 = vpop.sfrf %208 }
 0x104   :  { %p301_p6 = scmp.ne.s32.totalorder %s209_s6, 0 }
 0x106   :  { %213 = shalt.err (%p301_p6)  }
 0x107   :  { %215 = vsyncmov [#allocation2 + $0x2] }
 0x10a   :  { %s216_s7 = vpop.sfrf %215 }
 0x10b   :  { %p302_p8 = scmp.ne.s32.totalorder %s216_s7, 0 }
 0x10d   :  { %220 = shalt.err (%p302_p8)  }
 0x10e   :  { %222 = vsyncmov [#allocation2 + $0x3] }
 0x111   :  { %s223_s9 = vpop.sfrf %222 }
 0x112   :  { %p303_p9 = scmp.ne.s32.totalorder %s223_s9, 0 }
 0x114   :  { %227 = shalt.err (%p303_p9)  }
 0x115   :  { %229 = vsyncmov [#allocation2 + $0x4] }
 0x118   :  { %s230_s2 = vpop.sfrf %229 }
 0x119   :  { %p304_p12 = scmp.ne.s32.totalorder %s230_s2, 0 }
 0x11b   :  { %234 = shalt.err (%p304_p12)  }
 0x11c   :  { %236 = vsyncmov [#allocation2 + $0x5] }
 0x11f   :  { %s237_s21 = vpop.sfrf %236 }
 0x120   :  { %p305_p10 = scmp.ne.s32.totalorder %s237_s21, 0 }
 0x122   :  { %241 = shalt.err (%p305_p10)  }
 0x123   :  { %243 = vsyncmov [#allocation2 + $0x6] }
 0x126   :  { %s244_s10 = vpop.sfrf %243 }
 0x127   :  { %p306_p11 = scmp.ne.s32.totalorder %s244_s10, 0 }
 0x129   :  { %248 = shalt.err (%p306_p11)  }
 0x12a   :  { %250 = vsyncmov [#allocation2 + $0x7] }
 0x12d   :  { %s251_s11 = vpop.sfrf %250 }
 0x12e   :  { %p307_p7 = scmp.ne.s32.totalorder %s251_s11, 0 }
 0x130   :  { %255 = shalt.err (%p307_p7)  }

</bundles_post_ra>
